<compile_context>
chip_gen: v7x
topology: tpu7x:2x2x1
jax: 0.10.0
libtpu: 0.0.40
codegen_flags: <defaults>
</compile_context>

<pallas_src>
import functools

import jax
import jax.numpy as jnp
from jax.experimental import pallas as pl
from jax.experimental.pallas import tpu as pltpu


# ------------------------------ small helpers ---------------------------------------
def _round_up(n, m):
    return (n + m - 1) // m * m


def _pad_axis(a, axis, target):
    pad = target - a.shape[axis]
    if pad == 0:
        return a
    widths = [(0, 0)] * a.ndim
    widths[axis] = (0, pad)
    return jnp.pad(a, widths)


# ------------------------------- Pallas kernel --------------------------------------
def mlp_kernel(*refs, dropout_probs, training):
    p1, p2 = dropout_probs
    if training:
        (x_ref, u1_ref, u2_ref,
         w1_ref, b1_ref, w2_ref, b2_ref, w3_ref, b3_ref, o_ref) = refs
    else:
        (x_ref, w1_ref, b1_ref, w2_ref, b2_ref, w3_ref, b3_ref, o_ref) = refs
        u1_ref = u2_ref = None

    def dropout(h, u_ref, prob):
        # Matches reference semantics: mask = (rand > prob); mask * h / (1 - prob)
        if (not training) or prob <= 0.0:
            return h
        if prob >= 1.0:
            return jnp.zeros_like(h)
        scale = 1.0 / (1.0 - prob)          # hoisted Python constant
        return jnp.where(u_ref[...] > prob, h * scale, 0.0)

    # layer 1: Linear -> ReLU -> dropout (training only)
    h = jnp.dot(x_ref[...], w1_ref[...], preferred_element_type=jnp.float32)
    h = jnp.maximum(h + b1_ref[...], 0.0)
    h = dropout(h, u1_ref, p1)

    # layer 2: Linear -> ReLU -> dropout (training only)
    h = jnp.dot(h.astype(jnp.bfloat16), w2_ref[...],
                preferred_element_type=jnp.float32)
    h = jnp.maximum(h + b2_ref[...], 0.0)
    h = dropout(h, u2_ref, p2)

    # output layer: Linear (no activation, no dropout), lane-dense 128-wide store
    o_ref[...] = (jnp.dot(h.astype(jnp.bfloat16), w3_ref[...],
                          preferred_element_type=jnp.float32) + b3_ref[...])


# ------------------------------- wrapper --------------------------------------------
def mlp_forward(x, params, dropout_probs, key=None, training=True, block_m=128):
    w1, b1, w2, b2, w3, b3 = params
    in_size, h1 = w1.shape
    h2 = w2.shape[1]
    out_size = w3.shape[1]

    xr = x.reshape(-1, in_size).astype(jnp.float32)
    batch = xr.shape[0]

    # pad every feature dim to a lane multiple (128); pad batch to the M tile
    in_p = _round_up(in_size, 128)
    h1_p = _round_up(h1, 128)
    h2_p = _round_up(h2, 128)
    out_p = _round_up(out_size, 128)
    tm = min(block_m, _round_up(batch, 8))
    batch_p = _round_up(batch, tm)
    grid = (batch_p // tm,)

    # bf16 inputs to the MXU; biases stay f32 (added after f32 accumulation)
    xr_p = _pad_axis(_pad_axis(xr, 0, batch_p), 1, in_p).astype(jnp.bfloat16)
    w1_p = _pad_axis(_pad_axis(w1, 0, in_p), 1, h1_p).astype(jnp.bfloat16)
    w2_p = _pad_axis(_pad_axis(w2, 0, h1_p), 1, h2_p).astype(jnp.bfloat16)
    w3_p = _pad_axis(_pad_axis(w3, 0, h2_p), 1, out_p).astype(jnp.bfloat16)
    b1_p = _pad_axis(b1.reshape(1, -1).astype(jnp.float32), 1, h1_p)
    b2_p = _pad_axis(b2.reshape(1, -1).astype(jnp.float32), 1, h2_p)
    b3_p = _pad_axis(b3.reshape(1, -1).astype(jnp.float32), 1, out_p)

    def row_spec(cols):
        return pl.BlockSpec((tm, cols), lambda i: (i, 0))

    def fixed_spec(shape):
        return pl.BlockSpec(shape, lambda i: (0, 0))   # stays VMEM-resident across grid

    in_specs = [row_spec(in_p)]
    operands = [xr_p]
    if training:
        if key is None:
            key = jax.random.PRNGKey(0)
        k1, k2 = jax.random.split(key)
        u1 = jax.random.uniform(k1, (batch_p, h1_p), jnp.float32)
        u2 = jax.random.uniform(k2, (batch_p, h2_p), jnp.float32)
        in_specs += [row_spec(h1_p), row_spec(h2_p)]
        operands += [u1, u2]
    in_specs += [fixed_spec((in_p, h1_p)), fixed_spec((1, h1_p)),
                 fixed_spec((h1_p, h2_p)), fixed_spec((1, h2_p)),
                 fixed_spec((h2_p, out_p)), fixed_spec((1, out_p))]
    operands += [w1_p, b1_p, w2_p, b2_p, w3_p, b3_p]

    kernel = functools.partial(
        mlp_kernel,
        dropout_probs=tuple(float(p) for p in dropout_probs),
        training=bool(training),
    )

    out = pl.pallas_call(
        kernel,
        out_shape=jax.ShapeDtypeStruct((batch_p, out_p), jnp.float32),
        grid=grid,
        in_specs=in_specs,
        out_specs=pl.BlockSpec((tm, out_p), lambda i: (i, 0)),
        compiler_params=pltpu.CompilerParams(
            dimension_semantics=("parallel",)),
    )(*operands)

    return out[:batch, :out_size]


# ------------------------------- param init -----------------------------------------
def init_linear(key, fan_in, fan_out):
    """Deterministic init mirroring nn.Linear's uniform(-1/sqrt(fan_in), 1/sqrt(fan_in))."""
    kw, kb = jax.random.split(key)
    bound = 1.0 / jnp.sqrt(jnp.float32(fan_in))
    w = jax.random.uniform(kw, (fan_in, fan_out), jnp.float32, -bound, bound)
    b = jax.random.uniform(kb, (fan_out,), jnp.float32, -bound, bound)
    return w, b


if __name__ == "__main__":
    # MLP(in_size=1024, hidden1=256, hidden2=128, out=64, dropout_probs=(0.2, 0.5))
    B, C, H, W = 2, 4, 16, 16
    in_size = C * H * W          # 1024
    hidden1_size, hidden2_size, out_size = 256, 128, 64
    dropout_probs = (0.2, 0.5)

    root = jax.random.PRNGKey(0)
    kx, k1, k2, k3, kdrop = jax.random.split(root, 5)

    x = jax.random.normal(kx, (B, C, H, W), jnp.float32)
    w1, b1 = init_linear(k1, in_size, hidden1_size)
    w2, b2 = init_linear(k2, hidden1_size, hidden2_size)
    w3, b3 = init_linear(k3, hidden2_size, out_size)
    params = (w1, b1, w2, b2, w3, b3)

    # ---- eval-mode forward (dropout skipped) ----
    out_eval = jax.block_until_ready(
        mlp_forward(x, params, dropout_probs, training=False))

    # ---- training-mode forward (dropout active) ----
    out_train = jax.block_until_ready(
        mlp_forward(x, params, dropout_probs, key=kdrop, training=True))

    # ---- pure-JAX references (same bf16 rounding of MXU inputs as the kernel) ----
    bf = lambda a: a.astype(jnp.bfloat16).astype(jnp.float32)
    xr = x.reshape(-1, in_size)

    ref_eval = jnp.maximum(bf(xr) @ bf(w1) + b1, 0.0)
    ref_eval = jnp.maximum(bf(ref_eval) @ bf(w2) + b2, 0.0)
    ref_eval = bf(ref_eval) @ bf(w3) + b3

    # reconstruct the exact dropout uniforms the wrapper generated
    tm = min(128, _round_up(B, 8))
    batch_p = _round_up(B, tm)
    h1_p, h2_p = _round_up(hidden1_size, 128), _round_up(hidden2_size, 128)
    kk1, kk2 = jax.random.split(kdrop)
    u1 = jax.random.uniform(kk1, (batch_p, h1_p), jnp.float32)[:B, :hidden1_size]
    u2 = jax.random.uniform(kk2, (batch_p, h2_p), jnp.float32)[:B, :hidden2_size]
    p1, p2 = dropout_probs

    ref_train = jnp.maximum(bf(xr) @ bf(w1) + b1, 0.0)
    ref_train = jnp.where(u1 > p1, ref_train / (1.0 - p1), 0.0)
    ref_train = jnp.maximum(bf(ref_train) @ bf(w2) + b2, 0.0)
    ref_train = jnp.where(u2 > p2, ref_train / (1.0 - p2), 0.0)
    ref_train = bf(ref_train) @ bf(w3) + b3

    assert out_eval.shape == (B, out_size)
    assert out_train.shape == (B, out_size)
    assert jnp.allclose(out_eval, ref_eval, atol=1e-2, rtol=1e-2)
    assert jnp.allclose(out_train, ref_train, atol=1e-2, rtol=1e-2)

    print("KERNEL_OK")
</pallas_src>

<mosaic_0001>
module attributes {stable_mosaic.version = 11 : i64} {
  func.func @mlp_kernel(%arg0: i32, %arg1: memref<8x1024xbf16, #tpu.memory_space<vmem>>, %arg2: memref<1024x256xbf16, #tpu.memory_space<vmem>>, %arg3: memref<1x256xf32, #tpu.memory_space<vmem>>, %arg4: memref<256x128xbf16, #tpu.memory_space<vmem>>, %arg5: memref<1x128xf32, #tpu.memory_space<vmem>>, %arg6: memref<128x128xbf16, #tpu.memory_space<vmem>>, %arg7: memref<1x128xf32, #tpu.memory_space<vmem>>, %arg8: memref<8x128xf32, #tpu.memory_space<vmem>>) attributes {dimension_semantics = [#tpu.dimension_semantics<parallel>], iteration_bounds = array<i64: 1>, scalar_prefetch = 0 : i64, scratch_operands = 0 : i64, tpu.core_type = #tpu.core_type<tc>, window_params = [{transform_indices = @transform_0, window_bounds = array<i64: 8, 1024>}, {pipeline_mode = #tpu.pipeline_mode<synchronous>, transform_indices = @transform_1, window_bounds = array<i64: 1024, 256>}, {pipeline_mode = #tpu.pipeline_mode<synchronous>, transform_indices = @transform_2, window_bounds = array<i64: 1, 256>}, {pipeline_mode = #tpu.pipeline_mode<synchronous>, transform_indices = @transform_3, window_bounds = array<i64: 256, 128>}, {pipeline_mode = #tpu.pipeline_mode<synchronous>, transform_indices = @transform_4, window_bounds = array<i64: 1, 128>}, {pipeline_mode = #tpu.pipeline_mode<synchronous>, transform_indices = @transform_5, window_bounds = array<i64: 128, 128>}, {pipeline_mode = #tpu.pipeline_mode<synchronous>, transform_indices = @transform_6, window_bounds = array<i64: 1, 128>}, {transform_indices = @transform_7, window_bounds = array<i64: 8, 128>}]} {
    %c0 = arith.constant 0 : index
    %c0_0 = arith.constant 0 : index
    %0 = vector.load %arg1[%c0, %c0_0] : memref<8x1024xbf16, #tpu.memory_space<vmem>>, vector<8x1024xbf16>
    %c0_1 = arith.constant 0 : index
    %c0_2 = arith.constant 0 : index
    %1 = vector.load %arg2[%c0_1, %c0_2] : memref<1024x256xbf16, #tpu.memory_space<vmem>>, vector<1024x256xbf16>
    %cst = arith.constant dense<0.000000e+00> : vector<8x256xf32>
    %2 = tpu.matmul %0, %1, %cst {dimension_numbers = #tpu.dot_dimension_numbers<[1], [0], [0], [1], [0, 0, 1, 1], [], []>} : vector<8x1024xbf16>, vector<1024x256xbf16>, vector<8x256xf32> -> vector<8x256xf32>
    %c0_3 = arith.constant 0 : index
    %c0_4 = arith.constant 0 : index
    %3 = vector.load %arg3[%c0_3, %c0_4] : memref<1x256xf32, #tpu.memory_space<vmem>>, vector<1x256xf32>
    %4 = vector.broadcast %3 : vector<1x256xf32> to vector<8x256xf32>
    %5 = arith.addf %2, %4 : vector<8x256xf32>
    %cst_5 = arith.constant 0.000000e+00 : f32
    %6 = vector.broadcast %cst_5 : f32 to vector<8x256xf32>
    %7 = arith.maximumf %5, %6 : vector<8x256xf32>
    %8 = arith.truncf %7 : vector<8x256xf32> to vector<8x256xbf16>
    %c0_6 = arith.constant 0 : index
    %c0_7 = arith.constant 0 : index
    %9 = vector.load %arg4[%c0_6, %c0_7] : memref<256x128xbf16, #tpu.memory_space<vmem>>, vector<256x128xbf16>
    %cst_8 = arith.constant dense<0.000000e+00> : vector<8x128xf32>
    %10 = tpu.matmul %8, %9, %cst_8 {dimension_numbers = #tpu.dot_dimension_numbers<[1], [0], [0], [1], [0, 0, 1, 1], [], []>} : vector<8x256xbf16>, vector<256x128xbf16>, vector<8x128xf32> -> vector<8x128xf32>
    %c0_9 = arith.constant 0 : index
    %c0_10 = arith.constant 0 : index
    %11 = vector.load %arg5[%c0_9, %c0_10] : memref<1x128xf32, #tpu.memory_space<vmem>>, vector<1x128xf32>
    %12 = vector.broadcast %11 : vector<1x128xf32> to vector<8x128xf32>
    %13 = arith.addf %10, %12 : vector<8x128xf32>
    %cst_11 = arith.constant 0.000000e+00 : f32
    %14 = vector.broadcast %cst_11 : f32 to vector<8x128xf32>
    %15 = arith.maximumf %13, %14 : vector<8x128xf32>
    %16 = arith.truncf %15 : vector<8x128xf32> to vector<8x128xbf16>
    %c0_12 = arith.constant 0 : index
    %c0_13 = arith.constant 0 : index
    %17 = vector.load %arg6[%c0_12, %c0_13] : memref<128x128xbf16, #tpu.memory_space<vmem>>, vector<128x128xbf16>
    %cst_14 = arith.constant dense<0.000000e+00> : vector<8x128xf32>
    %18 = tpu.matmul %16, %17, %cst_14 {dimension_numbers = #tpu.dot_dimension_numbers<[1], [0], [0], [1], [0, 0, 1, 1], [], []>} : vector<8x128xbf16>, vector<128x128xbf16>, vector<8x128xf32> -> vector<8x128xf32>
    %c0_15 = arith.constant 0 : index
    %c0_16 = arith.constant 0 : index
    %19 = vector.load %arg7[%c0_15, %c0_16] : memref<1x128xf32, #tpu.memory_space<vmem>>, vector<1x128xf32>
    %20 = vector.broadcast %19 : vector<1x128xf32> to vector<8x128xf32>
    %21 = arith.addf %18, %20 : vector<8x128xf32>
    %c0_17 = arith.constant 0 : index
    %c0_18 = arith.constant 0 : index
    %22 = vector.load %arg8[%c0_17, %c0_18] : memref<8x128xf32, #tpu.memory_space<vmem>>, vector<8x128xf32>
    tpu.vector_store %arg8[%c0_17, %c0_18], %21 {strides = array<i32>} : memref<8x128xf32, #tpu.memory_space<vmem>>, vector<8x128xf32>,
    return
  }
  func.func @transform_0(%arg0: i32) -> (i32, i32) {
    %c0_i32 = arith.constant 0 : i32
    %c0_i32_0 = arith.constant 0 : i32
    return %arg0, %c0_i32 : i32, i32
  }
  func.func @transform_1(%arg0: i32) -> (i32, i32) {
    %c0_i32 = arith.constant 0 : i32
    %c0_i32_0 = arith.constant 0 : i32
    %c0_i32_1 = arith.constant 0 : i32
    return %c0_i32, %c0_i32_0 : i32, i32
  }
  func.func @transform_2(%arg0: i32) -> (i32, i32) {
    %c0_i32 = arith.constant 0 : i32
    %c0_i32_0 = arith.constant 0 : i32
    %c0_i32_1 = arith.constant 0 : i32
    return %c0_i32, %c0_i32_0 : i32, i32
  }
  func.func @transform_3(%arg0: i32) -> (i32, i32) {
    %c0_i32 = arith.constant 0 : i32
    %c0_i32_0 = arith.constant 0 : i32
    %c0_i32_1 = arith.constant 0 : i32
    return %c0_i32, %c0_i32_0 : i32, i32
  }
  func.func @transform_4(%arg0: i32) -> (i32, i32) {
    %c0_i32 = arith.constant 0 : i32
    %c0_i32_0 = arith.constant 0 : i32
    %c0_i32_1 = arith.constant 0 : i32
    return %c0_i32, %c0_i32_0 : i32, i32
  }
  func.func @transform_5(%arg0: i32) -> (i32, i32) {
    %c0_i32 = arith.constant 0 : i32
    %c0_i32_0 = arith.constant 0 : i32
    %c0_i32_1 = arith.constant 0 : i32
    return %c0_i32, %c0_i32_0 : i32, i32
  }
  func.func @transform_6(%arg0: i32) -> (i32, i32) {
    %c0_i32 = arith.constant 0 : i32
    %c0_i32_0 = arith.constant 0 : i32
    %c0_i32_1 = arith.constant 0 : i32
    return %c0_i32, %c0_i32_0 : i32, i32
  }
  func.func @transform_7(%arg0: i32) -> (i32, i32) {
    %c0_i32 = arith.constant 0 : i32
    %c0_i32_0 = arith.constant 0 : i32
    return %arg0, %c0_i32 : i32, i32
  }
}

</mosaic_0001>

<bundles_post_ra>
// kernel: tpu_custom_call.1
= control target key start
LH: loop header
LB: loop body
LE: loop exit
PB: predicated region body
PF: predicated region fallthrough
CT: control target
= control target key end

     0   :  { %12 = vsyncpa [#allocation3], 0  ;;  %s2083_s0 = inlined_call_operand.hbm [shape: bf16[8,1024], index: 0, kind: input, shape index: {}]   ;;  %s2084_s1 = inlined_call_operand.hbm [shape: bf16[1024,256], index: 1, kind: input, shape index: {}]   ;;  %s2085_s2 = inlined_call_operand.vmem [shape: f32[1,256], index: 2, kind: input, shape index: {}]   ;;  %s2086_s3 = inlined_call_operand.hbm [shape: bf16[256,128], index: 3, kind: input, shape index: {}]   ;;  %s2087_s4 = inlined_call_operand.vmem [shape: f32[1,128], index: 4, kind: input, shape index: {}]   ;;  %s2088_s5 = inlined_call_operand.hbm [shape: bf16[128,128], index: 5, kind: input, shape index: {}]   ;;  %s2089_s6 = inlined_call_operand.vmem [shape: f32[1,128], index: 6, kind: input, shape index: {}]   ;;  %s2090_s7 = inlined_call_operand.hbm [shape: f32[8,128], index: 7, kind: output, shape index: {}]  }
   0x1   :  { %13 = vsyncpa [#allocation6], 0 }
   0x2   :  { %14 = vsyncpa [#allocation9], 0 }
   0x3   :  { %15 = vsyncpa [#allocation4], 0  ;;  %s1945_s24 = smov [#allocation5]   ;;  %s1827_s28 = scalar_lea.hbm %s2084_s1, 16384 }
   0x4   :  { %s31_s25 = sshll.u32 %s1945_s24, 4  ;;  %p1828_p0 = scmp.ne.s32.totalorder %s2084_s1, %s1827_s28  ;;  %s32_s25 = int_to_ptr.vmem [resolvable:$true] %s31_s25 }
   0x5   :  { %p1831_p1 = scmp.lt.u32.totalorder %s1827_s28, %s2084_s1 }
   0x7   :  { %p1833_p2 = pnand %p1831_p1, %p1828_p0 }
   0x9   :  { %1836 = shalt.err (!%p1833_p2)
}
   0xa   :  { %s1837_s10 = scalar_lea.vmem %s32_s25, 16384  ;;  %p1842_p4 = scmp.lt.s32.totalorder %s32_s25, %s32_s25 }
   0xb   :  { %p1838_p3 = scmp.ne.s32.totalorder %s32_s25, %s1837_s10  ;;  %p1843_p5 = scmp.lt.s32.totalorder %s1837_s10, %s1837_s10 }
   0xd   :  { %p1844_p6 = por %p1843_p5, %p1842_p4 }
   0xf   :  { %p1845_p7 = pnand %p1844_p6, %p1838_p3 }
  0x11   :  { %1848 = shalt.err (!%p1845_p7)
}
  0x12   :  { %s1946_s11 = smov 128   ;;  %s1947_s12 = smov 8  }
  0x13   :  { %37 = dma.hbm_to_vmem [thread:$0]  %s2084_s1, 16384, %s32_s25, [#allocation6], %s1946_s11, %s1946_s11, %s1947_s12  }
  0x14   :  { %s1948_s15 = smov [#allocation2]   ;;  %s1949_s17 = smov [#allocation7]  }
  0x15   :  { %s22_s16 = sshll.u32 %s1948_s15, 4  ;;  %s45_s18 = sshll.u32 %s1949_s17, 4  ;;  %s23_s16 = int_to_ptr.vmem [resolvable:$true] %s22_s16  ;;  %s46_s18 = int_to_ptr.vmem [resolvable:$true] %s45_s18 }
  0x16   :  { %s1849_s21 = scalar_lea.hbm %s2083_s0, 512 }
  0x17   :  { %p1850_p8 = scmp.ne.s32.totalorder %s2083_s0, %s1849_s21  ;;  %p1853_p9 = scmp.lt.u32.totalorder %s1849_s21, %s2083_s0 }
  0x19   :  { %p1855_p10 = pnand %p1853_p9, %p1850_p8 }
  0x1b   :  { %1858 = shalt.err (!%p1855_p10)
}
  0x1c   :  { %s1859_s1 = scalar_lea.vmem %s23_s16, 512  ;;  %p1864_p12 = scmp.lt.s32.totalorder %s23_s16, %s23_s16 }
  0x1d   :  { %p1860_p11 = scmp.ne.s32.totalorder %s23_s16, %s1859_s1  ;;  %p1865_p13 = scmp.lt.s32.totalorder %s1859_s1, %s1859_s1 }
  0x1f   :  { %p1866_p0 = por %p1865_p13, %p1864_p12 }
  0x21   :  { %p1867_p1 = pnand %p1866_p0, %p1860_p11 }
  0x23   :  { %1870 = shalt.err (!%p1867_p1)
}
  0x24   :  { %25 = dma.hbm_to_vmem [thread:$0]  %s2083_s0, 512, %s23_s16, [#allocation3]  }
  0x25   :  { %s1871_s30 = scalar_lea.hbm %s2086_s3, 2048 }
  0x26   :  { %p1872_p2 = scmp.ne.s32.totalorder %s2086_s3, %s1871_s30  ;;  %p1875_p3 = scmp.lt.u32.totalorder %s1871_s30, %s2086_s3 }
  0x28   :  { %p1877_p4 = pnand %p1875_p3, %p1872_p2 }
  0x2a   :  { %1880 = shalt.err (!%p1877_p4)
}
  0x2b   :  { %s1881_s12 = scalar_lea.vmem %s46_s18, 2048  ;;  %p1886_p6 = scmp.lt.s32.totalorder %s46_s18, %s46_s18 }
  0x2c   :  { %p1882_p5 = scmp.ne.s32.totalorder %s46_s18, %s1881_s12  ;;  %p1887_p7 = scmp.lt.s32.totalorder %s1881_s12, %s1881_s12 }
  0x2e   :  { %p1888_p8 = por %p1887_p7, %p1886_p6 }
  0x30   :  { %p1889_p9 = pnand %p1888_p8, %p1882_p5 }
  0x32   :  { %1892 = shalt.err (!%p1889_p9)
}
  0x33   :  { %s1950_s0 = smov 64   ;;  %s1951_s13 = smov 4  }
  0x34   :  { %51 = dma.hbm_to_vmem [thread:$0]  %s2086_s3, 2048, %s46_s18, [#allocation6], %s1950_s0, %s1950_s0, %s1951_s13  }
  0x35   :  { %s1952_s16 = smov [#allocation8]   ;;  %s1893_s21 = scalar_lea.hbm %s2088_s5, 1024 }
  0x36   :  { %s59_s17 = sshll.u32 %s1952_s16, 4  ;;  %p1894_p10 = scmp.ne.s32.totalorder %s2088_s5, %s1893_s21  ;;  %s60_s17 = int_to_ptr.vmem [resolvable:$true] %s59_s17 }
  0x37   :  { %p1897_p11 = scmp.lt.u32.totalorder %s1893_s21, %s2088_s5 }
  0x39   :  { %p1899_p12 = pnand %p1897_p11, %p1894_p10 }
  0x3b   :  { %1902 = shalt.err (!%p1899_p12)
}
  0x3c   :  { %s1903_s1 = scalar_lea.vmem %s60_s17, 1024  ;;  %p1908_p0 = scmp.lt.s32.totalorder %s60_s17, %s60_s17 }
  0x3d   :  { %p1904_p13 = scmp.ne.s32.totalorder %s60_s17, %s1903_s1  ;;  %p1909_p1 = scmp.lt.s32.totalorder %s1903_s1, %s1903_s1 }
  0x3f   :  { %p1910_p2 = por %p1909_p1, %p1908_p0 }
  0x41   :  { %p1911_p3 = pnand %p1910_p2, %p1904_p13 }
  0x43   :  { %1914 = shalt.err (!%p1911_p3)
}
  0x44   :  { %65 = dma.hbm_to_vmem [thread:$0]  %s2088_s5, 1024, %s60_s17, [#allocation9], %s1950_s0, %s1950_s0, %s1951_s13  }
  0x45   :  { %1937 = dma.done.wait [#allocation3], 512  }
  0x46   :  { %1938 = vsyncadd [#allocation3], 4294966784 }
  0x47   :  { %1939 = dma.done.wait [#allocation6], 18432  }
  0x48   :  { %1940 = vsyncadd [#allocation6], 4294948864 }
  0x49   :  { %1941 = dma.done.wait [#allocation9], 1024  }
  0x4a   :  { %1942 = vsyncadd [#allocation9], 4294966272  ;;  %v1603_v0 = vld [vmem:[#allocation5 + $0x104] ss:$8 sps:$4 sm:$0xff]   ;;  %v1605_v1 = vld [vmem:[#allocation5 + $0x100] ss:$8 sps:$4 sm:$0xff]  }
  0x4b   :  { %934 = vmatprep.subr.bf16.mxu0 %v1603_v0  ;;  %v1606_v2 = vld [vmem:[#allocation5 + $0x114] ss:$8 sps:$4 sm:$0xff]   ;;  %v1608_v3 = vld [vmem:[#allocation5 + $0x110] ss:$8 sps:$4 sm:$0xff]   ;;  %v1609_v4 = vld [vmem:[#allocation5 + $0x124] ss:$8 sps:$4 sm:$0xff]  }
  0x4c   :  { %935 = vmatpush1.bf16.msra.mxu0 %v1605_v1  ;;  %v1611_v5 = vld [vmem:[#allocation5 + $0x120] ss:$8 sps:$4 sm:$0xff]   ;;  %v1612_v6 = vld [vmem:[#allocation5 + $0x134] ss:$8 sps:$4 sm:$0xff]   ;;  %v1614_v7 = vld [vmem:[#allocation5 + $0x130] ss:$8 sps:$4 sm:$0xff]  }
  0x4d   :  { %936 = vmatprep.subr.bf16.mxu0 %v1606_v2  ;;  %v1615_v8 = vld [vmem:[#allocation5 + $0x144] ss:$8 sps:$4 sm:$0xff]   ;;  %v1617_v9 = vld [vmem:[#allocation5 + $0x140] ss:$8 sps:$4 sm:$0xff]   ;;  %v1618_v10 = vld [vmem:[#allocation5 + $0x154] ss:$8 sps:$4 sm:$0xff]  }
  0x4e   :  { %v1620_v11 = vld [vmem:[#allocation5 + $0x150] ss:$8 sps:$4 sm:$0xff]   ;;  %v1621_v12 = vld [vmem:[#allocation5 + $0x164] ss:$8 sps:$4 sm:$0xff]   ;;  %v1623_v15 = vld [vmem:[#allocation5 + $0x160] ss:$8 sps:$4 sm:$0xff]  }
  0x4f   :  { %v2044_v13 = vld [vmem:[#allocation2 + $0x8] sm:$0xff]  ;;  %v1624_v16 = vld [vmem:[#allocation5 + $0x174] ss:$8 sps:$4 sm:$0xff]   ;;  %v1626_v17 = vld [vmem:[#allocation5 + $0x170] ss:$8 sps:$4 sm:$0xff]   ;;  %vm1954_vm0 = vmmov 0  }
  0x50   :  { %937 = vmatpush1.bf16.msra.mxu0 %v1608_v3  ;;  %v1370_v14 = vcombine.high %v2044_v13, %v2044_v13  ;;  %v1627_v18 = vld [vmem:[#allocation5 + $0x184] ss:$8 sps:$4 sm:$0xff]   ;;  %v1629_v19 = vld [vmem:[#allocation5 + $0x180] ss:$8 sps:$4 sm:$0xff]   ;;  %v1630_v20 = vld [vmem:[#allocation5 + $0x194] ss:$8 sps:$4 sm:$0xff]   ;;  %v1369_v48 = vcombine.low %v2044_v13, %v2044_v13 }
  0x51   :  { %938 = vmatprep.subr.bf16.mxu0 %v1609_v4  ;;  %v1632_v21 = vld [vmem:[#allocation5 + $0x190] ss:$8 sps:$4 sm:$0xff]   ;;  %v1633_v22 = vld [vmem:[#allocation5 + $0x1a4] ss:$8 sps:$4 sm:$0xff]   ;;  %v1635_v23 = vld [vmem:[#allocation5 + $0x1a0] ss:$8 sps:$4 sm:$0xff]  }
  0x52   :  { %966 = vmatprep.mubr.bf16.mxu0 %v1370_v14  ;;  %v1636_v24 = vld [vmem:[#allocation5 + $0x1b4] ss:$8 sps:$4 sm:$0xff]   ;;  %v1698_v25 = vld [vmem:[#allocation5 + $0x4] ss:$8 sps:$4 sm:$0xff]   ;;  %v1700_v26 = vld [vmem:[#allocation5] ss:$8 sps:$4 sm:$0xff]  }
  0x53   :  { %v1638_v27 = vld [vmem:[#allocation5 + $0x1b0] ss:$8 sps:$4 sm:$0xff]   ;;  %v1639_v28 = vld [vmem:[#allocation5 + $0x1c4] ss:$8 sps:$4 sm:$0xff]   ;;  %893 = vmatprep.subr.bf16.mxu1 %v1698_v25  ;;  %v1704_v29 = vld [vmem:[#allocation5 + $0x14] ss:$8 sps:$4 sm:$0xff]  }
  0x54   :  { %939 = vmatpush1.bf16.msra.mxu0 %v1611_v5  ;;  %894 = vmatpush1.bf16.msra.mxu1 %v1700_v26  ;;  %v1706_v30 = vld [vmem:[#allocation5 + $0x10] ss:$8 sps:$4 sm:$0xff]   ;;  %v1641_v31 = vld [vmem:[#allocation5 + $0x1c0] ss:$8 sps:$4 sm:$0xff]   ;;  %v1642_v32 = vld [vmem:[#allocation5 + $0x1d4] ss:$8 sps:$4 sm:$0xff]  }
  0x55   :  { %940 = vmatprep.subr.bf16.mxu0 %v1612_v6  ;;  %895 = vmatprep.subr.bf16.mxu1 %v1704_v29  ;;  %v1712_v33 = vld [vmem:[#allocation5 + $0x24] ss:$8 sps:$4 sm:$0xff]   ;;  %v1714_v34 = vld [vmem:[#allocation5 + $0x20] ss:$8 sps:$4 sm:$0xff]   ;;  %v1718_v35 = vld [vmem:[#allocation5 + $0x34] ss:$8 sps:$4 sm:$0xff]  }
  0x56   :  { %v1644_v36 = vld [vmem:[#allocation5 + $0x1d0] ss:$8 sps:$4 sm:$0xff]   ;;  %v1645_v37 = vld [vmem:[#allocation5 + $0x1e4] ss:$8 sps:$4 sm:$0xff]   ;;  %v1647_v40 = vld [vmem:[#allocation5 + $0x1e0] ss:$8 sps:$4 sm:$0xff]  }
  0x57   :  { %v1720_v38 = vld [vmem:[#allocation5 + $0x30] ss:$8 sps:$4 sm:$0xff]   ;;  %v1724_v39 = vld [vmem:[#allocation5 + $0x44] ss:$8 sps:$4 sm:$0xff]   ;;  %v1648_v41 = vld [vmem:[#allocation5 + $0x1f4] ss:$8 sps:$4 sm:$0xff]  }
  0x58   :  { %941 = vmatpush1.bf16.msra.mxu0 %v1614_v7  ;;  %896 = vmatpush1.bf16.msra.mxu1 %v1706_v30  ;;  %v1726_v42 = vld [vmem:[#allocation5 + $0x40] ss:$8 sps:$4 sm:$0xff]   ;;  %v1730_v43 = vld [vmem:[#allocation5 + $0x54] ss:$8 sps:$4 sm:$0xff]   ;;  %v1650_v44 = vld [vmem:[#allocation5 + $0x1f0] ss:$8 sps:$4 sm:$0xff]  }
  0x59   :  { %942 = vmatprep.subr.bf16.mxu0 %v1615_v8  ;;  %897 = vmatprep.subr.bf16.mxu1 %v1712_v33  ;;  %v1655_v45 = vld [vmem:[#allocation5 + $0x204] ss:$8 sps:$4 sm:$0xff]   ;;  %v2048_v46 = vld [vmem:[#allocation2 + $0x10] sm:$0xff]  ;;  %v1653_v50 = vld [vmem:[#allocation5 + $0x200] ss:$8 sps:$4 sm:$0xff]   ;;  %s1955_s30 = smov [#allocation10]  }
  0x5a   :  { %v1732_v47 = vld [vmem:[#allocation5 + $0x50] ss:$8 sps:$4 sm:$0xff]   ;;  %v1736_v49 = vld [vmem:[#allocation5 + $0x64] ss:$8 sps:$4 sm:$0xff]   ;;  %v1372_v51 = vcombine.high %v2048_v46, %v2048_v46  ;;  %v1658_v52 = vld [vmem:[#allocation5 + $0x214] ss:$8 sps:$4 sm:$0xff]  }
  0x5b   :  { %v1738_v53 = vld [vmem:[#allocation5 + $0x60] ss:$8 sps:$4 sm:$0xff]   ;;  %v1742_v54 = vld [vmem:[#allocation5 + $0x74] ss:$8 sps:$4 sm:$0xff]   ;;  %v1656_v55 = vld [vmem:[#allocation5 + $0x210] ss:$8 sps:$4 sm:$0xff]  }
  0x5c   :  { %943 = vmatpush1.bf16.msra.mxu0 %v1617_v9  ;;  %898 = vmatpush1.bf16.msra.mxu1 %v1714_v34  ;;  %v1661_v56 = vld [vmem:[#allocation5 + $0x224] ss:$8 sps:$4 sm:$0xff]   ;;  %v1744_v57 = vld [vmem:[#allocation5 + $0x70] ss:$8 sps:$4 sm:$0xff]   ;;  %v1659_v59 = vld [vmem:[#allocation5 + $0x220] ss:$8 sps:$4 sm:$0xff]  }
  0x5d   :  { %944 = vmatprep.subr.bf16.mxu0 %v1618_v10  ;;  %899 = vmatprep.subr.bf16.mxu1 %v1718_v35  ;;  %v1748_v58 = vld [vmem:[#allocation5 + $0x84] ss:$8 sps:$4 sm:$0xff]   ;;  %v1664_v60 = vld [vmem:[#allocation5 + $0x234] ss:$8 sps:$4 sm:$0xff]   ;;  %v1750_v61 = vld [vmem:[#allocation5 + $0x80] ss:$8 sps:$4 sm:$0xff]  }
  0x5e   :  { %v1754_v62 = vld [vmem:[#allocation5 + $0x94] ss:$8 sps:$4 sm:$0xff]   ;;  %v1662_v63 = vld [vmem:[#allocation5 + $0x230] ss:$8 sps:$4 sm:$0xff]   ;;  %v1667_v0 = vld [vmem:[#allocation5 + $0x244] ss:$8 sps:$4 sm:$0xff]  }
  0x5f   :  { %v1756_v1 = vld [vmem:[#allocation5 + $0x90] ss:$8 sps:$4 sm:$0xff]   ;;  %v1760_v2 = vld [vmem:[#allocation5 + $0xa4] ss:$8 sps:$4 sm:$0xff]   ;;  %v1665_v3 = vld [vmem:[#allocation5 + $0x240] ss:$8 sps:$4 sm:$0xff]  }
  0x60   :  { %945 = vmatpush1.bf16.msra.mxu0 %v1620_v11  ;;  %900 = vmatpush1.bf16.msra.mxu1 %v1720_v38  ;;  %v1670_v4 = vld [vmem:[#allocation5 + $0x254] ss:$8 sps:$4 sm:$0xff]   ;;  %v1762_v5 = vld [vmem:[#allocation5 + $0xa0] ss:$8 sps:$4 sm:$0xff]   ;;  %v1668_v7 = vld [vmem:[#allocation5 + $0x250] ss:$8 sps:$4 sm:$0xff]  }
  0x61   :  { %946 = vmatprep.subr.bf16.mxu0 %v1621_v12  ;;  %901 = vmatprep.subr.bf16.mxu1 %v1724_v39  ;;  %v1766_v6 = vld [vmem:[#allocation5 + $0xb4] ss:$8 sps:$4 sm:$0xff]   ;;  %v1673_v8 = vld [vmem:[#allocation5 + $0x264] ss:$8 sps:$4 sm:$0xff]   ;;  %v1768_v10 = vld [vmem:[#allocation5 + $0xb0] ss:$8 sps:$4 sm:$0xff]  }
  0x62   :  { %v81_v9 = vld [vmem:[#allocation2] sm:$0xff]  ;;  %v1676_v14 = vld [vmem:[#allocation5 + $0x274] ss:$8 sps:$4 sm:$0xff]   ;;  %v1680_v25 = vld [vmem:[#allocation5 + $0x290] ss:$8 sps:$4 sm:$0xff]   ;;  %s1356_s8 = sshll.u32 %s1955_s30, 4  ;;  %s1357_s8 = int_to_ptr.vmem [resolvable:$true] %s1356_s8 }
  0x63   :  { %v1368_v11 = vcombine.high %v81_v9, %v81_v9  ;;  %v1772_v12 = vld [vmem:[#allocation5 + $0xc4] ss:$8 sps:$4 sm:$0xff]   ;;  %v1671_v13 = vld [vmem:[#allocation5 + $0x260] ss:$8 sps:$4 sm:$0xff]   ;;  %v1688_v30 = vld [vmem:[#allocation5 + $0x2b4] ss:$8 sps:$4 sm:$0xff]   ;;  %p1920_p5 = scmp.lt.s32.totalorder %s1357_s8, %s1357_s8 }
  0x64   :  { %947 = vmatpush1.bf16.msra.mxu0 %v1623_v15  ;;  %902 = vmatpush1.bf16.msra.mxu1 %v1726_v42  ;;  %v1774_v15 = vld [vmem:[#allocation5 + $0xc0] ss:$8 sps:$4 sm:$0xff]   ;;  %v1685_v26 = vld [vmem:[#allocation5 + $0x2a4] ss:$8 sps:$4 sm:$0xff]   ;;  %v1686_v34 = vld [vmem:[#allocation5 + $0x2b0] ss:$8 sps:$4 sm:$0xff]  }
  0x65   :  { %948 = vmatprep.subr.bf16.mxu0 %v1624_v16  ;;  %903 = vmatprep.subr.bf16.mxu1 %v1730_v43  ;;  %v1778_v16 = vld [vmem:[#allocation5 + $0xd4] ss:$8 sps:$4 sm:$0xff]   ;;  %v1683_v29 = vld [vmem:[#allocation5 + $0x2a0] ss:$8 sps:$4 sm:$0xff]   ;;  %v1691_v35 = vld [vmem:[#allocation5 + $0x2c4] ss:$8 sps:$4 sm:$0xff]  }
  0x66   :  { %925 = vmatprep.mubr.bf16.mxu1 %v1368_v11  ;;  %v1805_v33 = vld [vmem:[#allocation7 + $0x48] sm:$0xff]   ;;  %v1694_v39 = vld [vmem:[#allocation5 + $0x2d4] ss:$8 sps:$4 sm:$0xff]   ;;  %v1692_v42 = vld [vmem:[#allocation5 + $0x2d0] ss:$8 sps:$4 sm:$0xff]  }
  0x67   :  { %v1689_v38 = vld [vmem:[#allocation5 + $0x2c0] ss:$8 sps:$4 sm:$0xff]   ;;  %v1697_v43 = vld [vmem:[#allocation5 + $0x2e4] ss:$8 sps:$4 sm:$0xff]   ;;  %v1777_v11 = vld [vmem:[#allocation5 + $0x3b4] ss:$8 sps:$4 sm:$0xff]  }
  0x68   :  { %949 = vmatpush1.bf16.msra.mxu0 %v1626_v17  ;;  %904 = vmatpush1.bf16.msra.mxu1 %v1732_v47  ;;  %v1674_v17 = vld [vmem:[#allocation5 + $0x270] ss:$8 sps:$4 sm:$0xff]   ;;  %v1695_v47 = vld [vmem:[#allocation5 + $0x2e0] ss:$8 sps:$4 sm:$0xff]  }
  0x69   :  { %950 = vmatprep.subr.bf16.mxu0 %v1627_v18  ;;  %905 = vmatprep.subr.bf16.mxu1 %v1736_v49  ;;  %v1679_v18 = vld [vmem:[#allocation5 + $0x284] ss:$8 sps:$4 sm:$0xff]  }
  0x6a   :  { %v1812_v49 = vld [vmem:[#allocation7 + $0x20] sm:$0xff]  }
  0x6c   :  { %951 = vmatpush1.bf16.msra.mxu0 %v1629_v19  ;;  %906 = vmatpush1.bf16.msra.mxu1 %v1738_v53  ;;  %v1677_v19 = vld [vmem:[#allocation5 + $0x280] ss:$8 sps:$4 sm:$0xff]   ;;  %v1371_v53 = vcombine.low %v2048_v46, %v2048_v46  ;;  %v1735_v46 = vld [vmem:[#allocation5 + $0x344] ss:$8 sps:$4 sm:$0xff]  }
  0x6d   :  { %952 = vmatprep.subr.bf16.mxu0 %v1630_v20  ;;  %907 = vmatprep.subr.bf16.mxu1 %v1742_v54  ;;  %v1780_v20 = vld [vmem:[#allocation5 + $0xd0] ss:$8 sps:$4 sm:$0xff]   ;;  %v1709_v54 = vld [vmem:[#allocation5 + $0x300] ss:$8 sps:$4 sm:$0xff]  }
  0x70   :  { %953 = vmatpush1.bf16.msra.mxu0 %v1632_v21  ;;  %908 = vmatpush1.bf16.msra.mxu1 %v1744_v57  ;;  %v1784_v21 = vld [vmem:[#allocation5 + $0xe4] ss:$8 sps:$4 sm:$0xff]   ;;  %v1715_v57 = vld [vmem:[#allocation5 + $0x310] ss:$8 sps:$4 sm:$0xff]  }
  0x71   :  { %954 = vmatprep.subr.bf16.mxu0 %v1633_v22  ;;  %909 = vmatprep.subr.bf16.mxu1 %v1748_v58  ;;  %v1682_v22 = vld [vmem:[#allocation5 + $0x294] ss:$8 sps:$4 sm:$0xff]   ;;  %v1723_v58 = vld [vmem:[#allocation5 + $0x324] ss:$8 sps:$4 sm:$0xff]  }
  0x74   :  { %955 = vmatpush1.bf16.msra.mxu0 %v1635_v23  ;;  %910 = vmatpush1.bf16.msra.mxu1 %v1750_v61  ;;  %v1786_v23 = vld [vmem:[#allocation5 + $0xe0] ss:$8 sps:$4 sm:$0xff]   ;;  %v1727_v61 = vld [vmem:[#allocation5 + $0x330] ss:$8 sps:$4 sm:$0xff]  }
  0x75   :  { %956 = vmatprep.subr.bf16.mxu0 %v1636_v24  ;;  %911 = vmatprep.subr.bf16.mxu1 %v1754_v62  ;;  %v1790_v24 = vld [vmem:[#allocation5 + $0xf4] ss:$8 sps:$4 sm:$0xff]   ;;  %v1733_v62 = vld [vmem:[#allocation5 + $0x340] ss:$8 sps:$4 sm:$0xff]  }
  0x78   :  { %957 = vmatpush1.bf16.msra.mxu0 %v1638_v27  ;;  %912 = vmatpush1.bf16.msra.mxu1 %v1756_v1  ;;  %v1792_v27 = vld [vmem:[#allocation5 + $0xf0] ss:$8 sps:$4 sm:$0xff]   ;;  %v1747_v1 = vld [vmem:[#allocation5 + $0x364] ss:$8 sps:$4 sm:$0xff]  }
  0x79   :  { %958 = vmatprep.subr.bf16.mxu0 %v1639_v28  ;;  %913 = vmatprep.subr.bf16.mxu1 %v1760_v2  ;;  %v1803_v28 = vld [vmem:[#allocation7 + $0x40] sm:$0xff]  }
  0x7a   :  { %v1745_v2 = vld [vmem:[#allocation5 + $0x360] ss:$8 sps:$4 sm:$0xff]  }
  0x7c   :  { %959 = vmatpush1.bf16.msra.mxu0 %v1641_v31  ;;  %914 = vmatpush1.bf16.msra.mxu1 %v1762_v5  ;;  %v1804_v31 = vld [vmem:[#allocation7] sm:$0xff]  }
  0x7d   :  { %960 = vmatprep.subr.bf16.mxu0 %v1642_v32  ;;  %915 = vmatprep.subr.bf16.mxu1 %v1766_v6  ;;  %v1367_v32 = vcombine.low %v81_v9, %v81_v9  ;;  %v1759_v5 = vld [vmem:[#allocation5 + $0x384] ss:$8 sps:$4 sm:$0xff]   ;;  %v1757_v6 = vld [vmem:[#allocation5 + $0x380] ss:$8 sps:$4 sm:$0xff]  }
  0x7e   :  { %v1771_v9 = vld [vmem:[#allocation5 + $0x3a4] ss:$8 sps:$4 sm:$0xff]  }
  0x80   :  { %961 = vmatpush1.bf16.msra.mxu0 %v1644_v36  ;;  %916 = vmatpush1.bf16.msra.mxu1 %v1768_v10  ;;  %v1806_v36 = vld [vmem:[#allocation7 + $0x8] sm:$0xff]  }
  0x81   :  { %962 = vmatprep.subr.bf16.mxu0 %v1645_v37  ;;  %917 = vmatprep.subr.bf16.mxu1 %v1772_v12  ;;  %v1807_v37 = vld [vmem:[#allocation7 + $0x50] sm:$0xff]   ;;  %v1769_v10 = vld [vmem:[#allocation5 + $0x3a0] ss:$8 sps:$4 sm:$0xff]  }
  0x82   :  { %v1775_v12 = vld [vmem:[#allocation5 + $0x3b0] ss:$8 sps:$4 sm:$0xff]  }
  0x84   :  { %963 = vmatpush1.bf16.msra.mxu0 %v1647_v40  ;;  %918 = vmatpush1.bf16.msra.mxu1 %v1774_v15  ;;  %v1808_v40 = vld [vmem:[#allocation7 + $0x10] sm:$0xff]  }
  0x85   :  { %964 = vmatprep.subr.bf16.mxu0 %v1648_v41  ;;  %919 = vmatprep.subr.bf16.mxu1 %v1778_v16  ;;  %v1809_v41 = vld [vmem:[#allocation7 + $0x58] sm:$0xff]  }
  0x86   :  { %v1789_v15 = vld [vmem:[#allocation5 + $0x3d4] ss:$8 sps:$4 sm:$0xff]   ;;  %v1787_v16 = vld [vmem:[#allocation5 + $0x3d0] ss:$8 sps:$4 sm:$0xff]  }
  0x88   :  { %965 = vmatpush1.bf16.msra.mxu0 %v1650_v44  ;;  %920 = vmatpush1.bf16.msra.mxu1 %v1780_v20  ;;  %v1810_v44 = vld [vmem:[#allocation7 + $0x18] sm:$0xff]  }
  0x89   :  { %975 = vmatprep.subr.bf16.mxu0 %v1655_v45  ;;  %921 = vmatprep.subr.bf16.mxu1 %v1784_v21  ;;  %v1811_v45 = vld [vmem:[#allocation7 + $0x60] sm:$0xff]   ;;  %v1798_v20 = vld [vmem:[#allocation5 + $0x3f0] ss:$8 sps:$4 sm:$0xff]  }
  0x8b   :  { %967 = vmatmul.mubr.bf16.vlgmr.msra.gmra.mrb[0].mxu0 %v1369_v48  ;;  %v1703_v48 = vld [vmem:[#allocation5 + $0x2f4] ss:$8 sps:$4 sm:$0xff]  }
  0x8c   :  { %976 = vmatpush1.bf16.msra.mxu0 %v1653_v50  ;;  %1007 = vmatprep.mubr.bf16.mxu0 %v1372_v51  ;;  %v1701_v50 = vld [vmem:[#allocation5 + $0x2f0] ss:$8 sps:$4 sm:$0xff]   ;;  %v1711_v51 = vld [vmem:[#allocation5 + $0x304] ss:$8 sps:$4 sm:$0xff]  }
  0x8d   :  { %977 = vmatprep.subr.bf16.mxu0 %v1658_v52  ;;  %922 = vmatpush1.bf16.msra.mxu1 %v1786_v23  ;;  %v2054_v52 = vld [vmem:[#allocation2 + $0x18] sm:$0xff]  ;;  %v1814_v23 = vld [vmem:[#allocation7 + $0x28] sm:$0xff]  }
  0x8e   :  { %923 = vmatprep.subr.bf16.mxu1 %v1790_v24  ;;  %v1373_v21 = vcombine.low %v2054_v52, %v2054_v52  ;;  %v1815_v24 = vld [vmem:[#allocation7 + $0x70] sm:$0xff]  }
  0x90   :  { %978 = vmatpush1.bf16.msra.mxu0 %v1656_v55  ;;  %v1374_v55 = vcombine.high %v2054_v52, %v2054_v52  ;;  %v1819_v52 = vld [vmem:[#allocation8] sm:$0xff]  }
  0x91   :  { %979 = vmatprep.subr.bf16.mxu0 %v1661_v56  ;;  %924 = vmatpush1.bf16.msra.mxu1 %v1792_v27  ;;  %v1717_v56 = vld [vmem:[#allocation5 + $0x314] ss:$8 sps:$4 sm:$0xff]  }
  0x92   :  { %1529 = vmatprep.subr.bf16.mxu1 %v1803_v28  ;;  %v1818_v27 = vld [vmem:[#allocation7 + $0x38] sm:$0xff]   ;;  %v1953_v28 = vmov 0.0  }
  0x94   :  { %980 = vmatpush1.bf16.msra.mxu0 %v1659_v59  ;;  %926 = vmatmul.mubr.bf16.vlgmr.msra.gmra.mrb[0].mxu1 %v1367_v32  ;;  %v1721_v59 = vld [vmem:[#allocation5 + $0x320] ss:$8 sps:$4 sm:$0xff]  }
  0x95   :  { %981 = vmatprep.subr.bf16.mxu0 %v1664_v60  ;;  %1530 = vmatpush3.bf16.msra.mxu1 %v1804_v31  ;;  %v1729_v60 = vld [vmem:[#allocation5 + $0x334] ss:$8 sps:$4 sm:$0xff]  }
  0x96   :  { %1531 = vmatprep.subr.bf16.mxu1 %v1805_v33  ;;  %v215_v33 = vlaneseq }
  0x98   :  { %982 = vmatpush1.bf16.msra.mxu0 %v1662_v63  ;;  %v1741_v63 = vld [vmem:[#allocation5 + $0x354] ss:$8 sps:$4 sm:$0xff]  }
  0x99   :  { %983 = vmatprep.subr.bf16.mxu0 %v1667_v0  ;;  %1532 = vmatpush3.bf16.msra.mxu1 %v1806_v36  ;;  %v1739_v0 = vld [vmem:[#allocation5 + $0x350] ss:$8 sps:$4 sm:$0xff]   ;;  %v213_v36 = vld [vmem:[%s2085_s2] sm:$0x3] }
  0x9a   :  { %1533 = vmatprep.subr.bf16.mxu1 %v1807_v37 }
  0x9c   :  { %984 = vmatpush1.bf16.msra.mxu0 %v1665_v3  ;;  %v1753_v3 = vld [vmem:[#allocation5 + $0x374] ss:$8 sps:$4 sm:$0xff]  }
  0x9d   :  { %985 = vmatprep.subr.bf16.mxu0 %v1670_v4  ;;  %1534 = vmatpush3.bf16.msra.mxu1 %v1808_v40  ;;  %v1751_v4 = vld [vmem:[#allocation5 + $0x370] ss:$8 sps:$4 sm:$0xff]  }
  0x9e   :  { %1535 = vmatprep.subr.bf16.mxu1 %v1809_v41 }
  0xa0   :  { %986 = vmatpush1.bf16.msra.mxu0 %v1668_v7  ;;  %v1765_v7 = vld [vmem:[#allocation5 + $0x394] ss:$8 sps:$4 sm:$0xff]  }
  0xa1   :  { %987 = vmatprep.subr.bf16.mxu0 %v1673_v8  ;;  %1536 = vmatpush3.bf16.msra.mxu1 %v1810_v44  ;;  %v1763_v8 = vld [vmem:[#allocation5 + $0x390] ss:$8 sps:$4 sm:$0xff]  }
  0xa2   :  { %1537 = vmatprep.subr.bf16.mxu1 %v1811_v45 }
  0xa4   :  { %988 = vmatpush1.bf16.msra.mxu0 %v1671_v13  ;;  %v1783_v13 = vld [vmem:[#allocation5 + $0x3c4] ss:$8 sps:$4 sm:$0xff]  }
  0xa5   :  { %989 = vmatprep.subr.bf16.mxu0 %v1676_v14  ;;  %1538 = vmatpush3.bf16.msra.mxu1 %v1812_v49  ;;  %v1781_v14 = vld [vmem:[#allocation5 + $0x3c0] ss:$8 sps:$4 sm:$0xff]  }
  0xa8   :  { %990 = vmatpush1.bf16.msra.mxu0 %v1674_v17  ;;  %v1795_v17 = vld [vmem:[#allocation5 + $0x3e4] ss:$8 sps:$4 sm:$0xff]  }
  0xa9   :  { %991 = vmatprep.subr.bf16.mxu0 %v1679_v18  ;;  %v1793_v18 = vld [vmem:[#allocation5 + $0x3e0] ss:$8 sps:$4 sm:$0xff]  }
  0xac   :  { %992 = vmatpush1.bf16.msra.mxu0 %v1677_v19  ;;  %v1800_v19 = vld [vmem:[#allocation5 + $0x3f4] ss:$8 sps:$4 sm:$0xff]  }
  0xad   :  { %993 = vmatprep.subr.bf16.mxu0 %v1682_v22  ;;  %v1813_v22 = vld [vmem:[#allocation7 + $0x68] sm:$0xff]  }
  0xae   :  { %1539 = vmatprep.subr.bf16.mxu1 %v1813_v22 }
  0xaf   :  { %1540 = vmatpush3.bf16.msra.mxu1 %v1814_v23 }
  0xb0   :  { %994 = vmatpush1.bf16.msra.mxu0 %v1680_v25  ;;  %v1816_v25 = vld [vmem:[#allocation7 + $0x30] sm:$0xff]   ;;  %1541 = vmatprep.subr.bf16.mxu1 %v1815_v24 }
  0xb1   :  { %995 = vmatprep.subr.bf16.mxu0 %v1685_v26  ;;  %v1817_v26 = vld [vmem:[#allocation7 + $0x78] sm:$0xff]  }
  0xb3   :  { %1542 = vmatpush3.bf16.msra.mxu1 %v1816_v25 }
  0xb4   :  { %996 = vmatpush1.bf16.msra.mxu0 %v1683_v29  ;;  %1543 = vmatprep.subr.bf16.mxu1 %v1817_v26 }
  0xb5   :  { %997 = vmatprep.subr.bf16.mxu0 %v1688_v30 }
  0xb7   :  { %1544 = vmatpush3.bf16.msra.mxu1 %v1818_v27 }
  0xb8   :  { %998 = vmatpush1.bf16.msra.mxu0 %v1686_v34  ;;  %1560 = vmatprep.subr.bf16.mxu1 %v1953_v28  ;;  %v216_v34 = vshrl.u32 %v215_v33, 7 }
  0xb9   :  { %999 = vmatprep.subr.bf16.mxu0 %v1691_v35 }
  0xba   :  { %v217_v35 = vsub.s32 0, %v216_v34  ;;  %v221_v37 = vsub.s32 1, %v216_v34 }
  0xbc   :  { %1000 = vmatpush1.bf16.msra.mxu0 %v1689_v38  ;;  %v218_v38 = vrot.slane %v213_v36, %v217_v35 }
  0xbd   :  { %1001 = vmatprep.subr.bf16.mxu0 %v1694_v39  ;;  %v222_v39 = vrot.slane %v213_v36, %v221_v37 }
  0xc0   :  { %1002 = vmatpush1.bf16.msra.mxu0 %v1692_v42 }
  0xc1   :  { %1003 = vmatprep.subr.bf16.mxu0 %v1697_v43 }
  0xc4   :  { %1004 = vmatpush1.bf16.msra.mxu0 %v1695_v47 }
  0xc5   :  { %1005 = vmatprep.subr.bf16.mxu0 %v1703_v48 }
  0xc8   :  { %1006 = vmatpush1.bf16.msra.mxu0 %v1701_v50 }
  0xc9   :  { %1016 = vmatprep.subr.bf16.mxu0 %v1711_v51 }
  0xcb   :  { %1008 = vmatmul.mubr.bf16.vlgmr.msra.gmra.mrb[0].mxu0 %v1371_v53 }
  0xcc   :  { %1017 = vmatpush1.bf16.msra.mxu0 %v1709_v54  ;;  %1048 = vmatprep.mubr.bf16.mxu0 %v1374_v55  ;;  %v1820_v54 = vld [vmem:[#allocation8 + $0x8] sm:$0xff]   ;;  %v1821_v55 = vld [vmem:[#allocation8 + $0x10] sm:$0xff]  }
  0xcd   :  { %1018 = vmatprep.subr.bf16.mxu0 %v1717_v56  ;;  %v1822_v56 = vld [vmem:[#allocation8 + $0x18] sm:$0xff]  }
  0xd0   :  { %1019 = vmatpush1.bf16.msra.mxu0 %v1715_v57  ;;  %v1823_v57 = vld [vmem:[#allocation8 + $0x20] sm:$0xff]  }
  0xd1   :  { %1020 = vmatprep.subr.bf16.mxu0 %v1723_v58  ;;  %v1824_v58 = vld [vmem:[#allocation8 + $0x28] sm:$0xff]  }
  0xd4   :  { %1021 = vmatpush1.bf16.msra.mxu0 %v1721_v59  ;;  %v1825_v59 = vld [vmem:[#allocation8 + $0x30] sm:$0xff]  }
  0xd5   :  { %1022 = vmatprep.subr.bf16.mxu0 %v1729_v60  ;;  %v1826_v60 = vld [vmem:[#allocation8 + $0x38] sm:$0xff]  }
  0xd8   :  { %1023 = vmatpush1.bf16.msra.mxu0 %v1727_v61 }
  0xd9   :  { %1024 = vmatprep.subr.bf16.mxu0 %v1735_v46  ;;  %v1503_v46 = vld [vmem:[%s2087_s4] ss:$0 sm:$0xff]  ;;  %s1915_s4 = scalar_lea.vmem %s1357_s8, 128 }
  0xda   :  { %p1916_p4 = scmp.ne.s32.totalorder %s1357_s8, %s1915_s4  ;;  %p1921_p6 = scmp.lt.s32.totalorder %s1915_s4, %s1915_s4 }
  0xdc   :  { %1025 = vmatpush1.bf16.msra.mxu0 %v1733_v62  ;;  %p1922_p7 = por %p1921_p6, %p1920_p5 }
  0xdd   :  { %1026 = vmatprep.subr.bf16.mxu0 %v1741_v63 }
  0xde   :  { %p1923_p8 = pnand %p1922_p7, %p1916_p4 }
  0xe0   :  { %1027 = vmatpush1.bf16.msra.mxu0 %v1739_v0 }
  0xe1   :  { %1028 = vmatprep.subr.bf16.mxu0 %v1747_v1 }
  0xe4   :  { %1029 = vmatpush1.bf16.msra.mxu0 %v1745_v2 }
  0xe5   :  { %1030 = vmatprep.subr.bf16.mxu0 %v1753_v3 }
  0xe8   :  { %1031 = vmatpush1.bf16.msra.mxu0 %v1751_v4 }
  0xe9   :  { %1032 = vmatprep.subr.bf16.mxu0 %v1759_v5  ;;  %v1520_v5 = vld [vmem:[%s2089_s6] ss:$0 sm:$0xff] }
  0xec   :  { %1033 = vmatpush1.bf16.msra.mxu0 %v1757_v6 }
  0xed   :  { %1034 = vmatprep.subr.bf16.mxu0 %v1765_v7 }
  0xf0   :  { %1035 = vmatpush1.bf16.msra.mxu0 %v1763_v8 }
  0xf1   :  { %1036 = vmatprep.subr.bf16.mxu0 %v1771_v9 }
  0xf4   :  { %1037 = vmatpush1.bf16.msra.mxu0 %v1769_v10 }
  0xf5   :  { %1038 = vmatprep.subr.bf16.mxu0 %v1777_v11 }
  0xf8   :  { %1039 = vmatpush1.bf16.msra.mxu0 %v1775_v12 }
  0xf9   :  { %1040 = vmatprep.subr.bf16.mxu0 %v1783_v13 }
  0xfc   :  { %1041 = vmatpush1.bf16.msra.mxu0 %v1781_v14 }
  0xfd   :  { %1042 = vmatprep.subr.bf16.mxu0 %v1789_v15 }
 0x100   :  { %1043 = vmatpush1.bf16.msra.mxu0 %v1787_v16 }
 0x101   :  { %1044 = vmatprep.subr.bf16.mxu0 %v1795_v17 }
 0x104   :  { %1045 = vmatpush1.bf16.msra.mxu0 %v1793_v18 }
 0x105   :  { %1046 = vmatprep.subr.bf16.mxu0 %v1800_v19 }
 0x108   :  { %1047 = vmatpush1.bf16.msra.mxu0 %v1798_v20 }
 0x10b   :  { %1049 = vmatmul.mubr.bf16.vlgmr.msra.gmra.mrb[0].mxu0 %v1373_v21 }
 0x167   :  { %v927_v29 = vpop.f32.mrb[0].mxu1 }
 0x168   :  { %v929_v30 = vpop.f32.mrb[1].mxu1  ;;  %v928_v40 = vadd.f32 %v927_v29, %v218_v38 }
 0x169   :  { %v931_v31 = vpop.f32.mrb[2].mxu1  ;;  %v930_v41 = vadd.f32 %v929_v30, %v222_v39 }
 0x16a   :  { %v932_v32 = vpop.f32.mrb[3].mxu1 }
 0x1de   :  { %v1050_v42 = vpop.f32.mrb[0].mxu0 }
 0x1df   :  { %v1581_v43 = vadd.f32 %v1050_v42, %v928_v40  ;;  %v1052_v44 = vpop.f32.mrb[1].mxu0 }
 0x1e0   :  { %v1583_v45 = vadd.f32 %v1052_v44, %v930_v41  ;;  %v1054_v47 = vpop.f32.mrb[2].mxu0 }
 0x1e1   :  { %v1057_v48 = vmax.f32 %v1581_v43, 0.0  ;;  %v1055_v49 = vpop.f32.mrb[3].mxu0 }
 0x1e2   :  { %v1058_v50 = vmax.f32 %v1583_v45, 0.0 }
 0x1e3   :  { %v1059_v53 = vpack.c.bf16 %v1057_v48, %v1057_v48 }
 0x1e4   :  { %v1060_v51 = vpack.c.bf16 %v1058_v50, %v1058_v50 }
 0x1e6   :  { %1228 = vmatprep.mubr.bf16.mxu1 %v1060_v51 }
 0x1e7   :  { %1229 = vmatmul.mubr.bf16.vlgmr.msra.gmra.mrb[4].mxu1 %v1059_v53 }
 0x1e8   :  { %1561 = vmatpush3.bf16.msra.mxu1 %v1819_v52  ;;  %1576 = vmatprep.mubr.msk.bf16.mxu1 %vm1954_vm0, %v1953_v28 }
 0x1e9   :  { %1562 = vmatprep.subr.bf16.mxu1 %v1953_v28 }
 0x1ec   :  { %1563 = vmatpush3.bf16.msra.mxu1 %v1820_v54 }
 0x1ed   :  { %1564 = vmatprep.subr.bf16.mxu1 %v1953_v28 }
 0x1f0   :  { %1565 = vmatpush3.bf16.msra.mxu1 %v1821_v55 }
 0x1f1   :  { %1566 = vmatprep.subr.bf16.mxu1 %v1953_v28 }
 0x1f4   :  { %1567 = vmatpush3.bf16.msra.mxu1 %v1822_v56 }
 0x1f5   :  { %1568 = vmatprep.subr.bf16.mxu1 %v1953_v28 }
 0x1f8   :  { %1569 = vmatpush3.bf16.msra.mxu1 %v1823_v57 }
 0x1f9   :  { %1570 = vmatprep.subr.bf16.mxu1 %v1953_v28 }
 0x1fc   :  { %1571 = vmatpush3.bf16.msra.mxu1 %v1824_v58 }
 0x1fd   :  { %1572 = vmatprep.subr.bf16.mxu1 %v1953_v28 }
 0x200   :  { %1573 = vmatpush3.bf16.msra.mxu1 %v1825_v59 }
 0x201   :  { %1574 = vmatprep.subr.bf16.mxu1 %v1953_v28 }
 0x204   :  { %1575 = vmatpush3.bf16.msra.mxu1 %v1826_v60 }
 0x2ba   :  { %v1545_v61 = vpop.f32.mrb[4].mxu1 }
 0x2bb   :  { %v1546_v62 = vpop.f32.mrb[5].mxu1 }
 0x2bc   :  { %v1547_v63 = vadd.f32 %v1546_v62, %v1545_v61  ;;  %v1548_v0 = vpop.f32.mrb[6].mxu1 }
 0x2bd   :  { %v1549_v1 = vpop.f32.mrb[7].mxu1 }
 0x2be   :  { %v1231_v2 = vadd.f32 %v1547_v63, %v1503_v46 }
 0x2c0   :  { %v1236_v3 = vmax.f32 %v1231_v2, 0.0 }
 0x2c2   :  { %v1237_v4 = vpack.c.bf16 %v1236_v3, %v1236_v3 }
 0x2c4   :  { %1577 = vmatmul.mubr.bf16.vlgmr.msra.gmra.mrb[8].mxu1 %v1237_v4 }
 0x397   :  { %v1343_v6 = vpop.f32.mrb[8].mxu1 }
 0x398   :  { %v1344_v7 = vadd.f32 %v1520_v5, %v1343_v6  ;;  %v1578_v8 = vpop.f32.mrb[9].mxu1 }
 0x399   :  { %v1346_v9 = vpop.f32.mrb[10].mxu1 }
 0x39a   :  { %1349 = vst [vmem:[#allocation10] sm:$0xff] %v1344_v7  ;;  %v1579_v10 = vpop.f32.mrb[11].mxu1 }
 0x39b   :  { %1926 = shalt.err (!%p1923_p8)
}
 0x39c   :  { %s1927_s6 = scalar_lea.hbm %s2090_s7, 128 }
 0x39d   :  { %p1928_p9 = scmp.ne.s32.totalorder %s2090_s7, %s1927_s6  ;;  %p1931_p10 = scmp.lt.u32.totalorder %s1927_s6, %s2090_s7 }
 0x39f   :  { %p1933_p11 = pnand %p1931_p10, %p1928_p9 }
 0x3a1   :  { %1936 = shalt.err (!%p1933_p11)
}
 0x3a2   :  { %1359 = dma.vmem_to_hbm [thread:$0]  %s1357_s8, 128, %s2090_s7, [#allocation4]  }
 0x3a3   :  { %1943 = dma.done.wait [#allocation4], 128  }
 0x3a4   :  { %1944 = vsyncadd [#allocation4], 4294967168 }
 0x3a5   :  { %1363 = vsyncpa [#allocation3], 1 }
 0x3a6   :  { %1364 = vsyncpa [#allocation6], 1 }
 0x3a7   :  { %1365 = vsyncpa [#allocation9], 1 }
 0x3a8   :  { %1366 = vsyncpa [#allocation4], 1 }

</bundles_post_ra>
